<compile_context>
chip_gen: v5e
topology: v5e:2x2
jax: 0.10.0
libtpu: 0.0.40
codegen_flags: <defaults>
</compile_context>

<pallas_src>
import functools

import numpy as np
import jax
import jax.numpy as jnp
from jax import lax
from jax.experimental import pallas as pl
from jax.experimental.pallas import tpu as pltpu


# ---------------------------------------------------------------------------
# Pallas kernel: separable-gaussian heatmap splat
# ---------------------------------------------------------------------------
def _heatmap_kernel(meta_hbm, hm_ref, meta_smem, dma_sem, *, tile_h, fw, chunk_w):
    """Splat per-object gaussians into one (ncls, tile_h, fw) heatmap block.

    meta_hbm : (B, 8, max_objs_pad) int32 in HBM.  Rows per batch element:
               0:cx 1:cy 2:radius 3:valid 4:cls ; row 5, col 0 holds n_obj.
    hm_ref   : (ncls, tile_h, fw) float32 output block (batch dim squeezed).
    meta_smem: (8, max_objs_pad) int32 SMEM scratch (this batch's metadata).
    """
    f32 = jnp.float32
    b = pl.program_id(0)
    t = pl.program_id(1)
    row0 = t * tile_h

    # Per-batch metadata -> SMEM (16 KiB regardless of batch size).  The DMA is
    # overlapped with zero-initialising the output block, into which the splats
    # are max-accumulated directly (no VMEM scratch accumulator / final copy).
    cp = pltpu.make_async_copy(meta_hbm.at[b], meta_smem, dma_sem)
    cp.start()
    hm_ref[...] = jnp.zeros_like(hm_ref)
    cp.wait()

    row = lax.broadcasted_iota(jnp.int32, (tile_h, 1), 0) + row0      # (tile_h, 1)
    col = lax.broadcasted_iota(jnp.int32, (1, chunk_w), 1)            # (1, chunk_w)
    n_chunks = fw // chunk_w
    ncls = hm_ref.shape[0]

    n = meta_smem[5, 0]                        # number of in-task objects

    @pl.loop(0, n)
    def _(k):
        cx = meta_smem[0, k]
        cy = meta_smem[1, k]
        r = meta_smem[2, k]
        ok = meta_smem[3, k]
        c = meta_smem[4, k]
        # Skip padded / invalid objects and row-tiles the gaussian cannot reach.
        touches = (ok == 1) & (cy + r >= row0) & (cy - r <= row0 + tile_h - 1)

        @pl.when(touches)
        def _():
            pl.debug_check((c >= 0) & (c < ncls), "class id out of range")
            rf = r.astype(f32)
            sigma = (2.0 * rf + 1.0) / 6.0
            inv = 0.5 / (sigma * sigma)
            dyf = (row - cy).astype(f32)
            # draw_umich_gaussian clips the splat to |offset| <= radius; the eps
            # cutoff never triggers inside that window, so it is omitted.
            gy = jnp.where(jnp.abs(dyf) <= rf, jnp.exp(-(dyf * dyf) * inv), 0.0)

            # Only the lane-aligned 128-wide column chunks overlapped by
            # [cx - r, cx + r] are read-modify-written.
            for cb in range(n_chunks):
                c0 = cb * chunk_w

                @pl.when((cx + r >= c0) & (cx - r < c0 + chunk_w))
                def _():
                    dxf = (col + (c0 - cx)).astype(f32)
                    gx = jnp.where(jnp.abs(dxf) <= rf,
                                   jnp.exp(-(dxf * dxf) * inv), 0.0)
                    splat = gy * gx                        # (tile_h, chunk_w)
                    cur = hm_ref[c, :, c0:c0 + chunk_w]
                    hm_ref[c, :, c0:c0 + chunk_w] = jnp.maximum(cur, splat)


# ---------------------------------------------------------------------------
# Wrapper mirroring CenterPointLidarTarget
# ---------------------------------------------------------------------------
class CenterPointLidarTargetPallas:
    def __init__(self, grid_size, voxel_size, point_cloud_range, tasks,
                 dense_reg=1, max_objs=500, gaussian_overlap=0.1, min_radius=2,
                 out_size_factor=4, norm_bbox=True, with_velocity=False):
        self.class_names = [t["class_names"] for t in tasks]
        self.num_classes = [len(t["class_names"]) for t in tasks]
        self.grid_size = grid_size
        self.voxel_size = [float(v) for v in voxel_size]
        self.point_cloud_range = [float(v) for v in point_cloud_range]
        self.max_objs = max_objs * dense_reg
        self.gaussian_overlap = float(gaussian_overlap)
        self.min_radius = int(min_radius)
        self.out_size_factor = int(out_size_factor)
        self.norm_bbox = norm_bbox
        self.with_velocity = with_velocity
        self.fw = grid_size[0] // out_size_factor
        self.fh = grid_size[1] // out_size_factor
        # Metadata table width: lane-dense multiple of 128.
        self.max_objs_pad = max(128, ((self.max_objs + 127) // 128) * 128)

    # ---- heatmap kernel tiling -------------------------------------------
    def _heatmap_tiling(self, batch, ncls):
        fh, fw = self.fh, self.fw
        # Row tile: largest multiple-of-8 divisor of fh whose double-buffered
        # output block stays under ~8 MiB.  Fewer, larger tiles -> fewer serial
        # grid steps on single-TensorCore v5e/v6e, while the budget keeps the
        # working set far below v7x's 32 MiB scoped / 64 MiB physical VMEM.
        cands = [d for d in range(8, fh + 1, 8) if fh % d == 0]
        if not cands:
            cands = [fh]
        budget = 8 * 1024 * 1024
        fitting = [d for d in cands if 2 * ncls * d * fw * 4 <= budget]
        tile_h = max(fitting) if fitting else min(cands)
        # v7x megacore: keep at least two parallel grid steps.
        if batch * (fh // tile_h) < 2:
            smaller = [d for d in cands if d < tile_h]
            if smaller:
                tile_h = max(smaller)
        # Column chunking (only when fw is lane-tiled): per-object work drops
        # from O(tile_h * fw) to O(tile_h * 128 * chunks_touched).
        chunk_w = 128 if (fw % 128 == 0 and fw > 128) else fw
        return tile_h, fh // tile_h, chunk_w

    def _heatmap_call(self, batch, ncls):
        fh, fw = self.fh, self.fw
        tile_h, n_tiles, chunk_w = self._heatmap_tiling(batch, ncls)
        kernel = functools.partial(_heatmap_kernel, tile_h=tile_h, fw=fw,
                                   chunk_w=chunk_w)
        return pl.pallas_call(
            kernel,
            grid=(batch, n_tiles),
            in_specs=[pl.BlockSpec(memory_space=pl.ANY)],     # meta stays in HBM
            out_specs=pl.BlockSpec((None, ncls, tile_h, fw),
                                   lambda b, t: (b, 0, t, 0)),
            out_shape=jax.ShapeDtypeStruct((batch, ncls, fh, fw), jnp.float32),
            scratch_shapes=[
                pltpu.SMEM((8, self.max_objs_pad), jnp.int32),
                pltpu.SemaphoreType.DMA(()),
            ],
            compiler_params=pltpu.CompilerParams(
                dimension_semantics=("parallel", "parallel"),
                vmem_limit_bytes=32 * 1024 * 1024),
        )

    # ---- per-object targets (plain JAX, vmapped over batch) ---------------
    # Variable-length per-class torch.where + cat selection has no clean Pallas
    # form -> padded class-major stable argsort; the remaining per-object math
    # is O(max_objs) elementwise and fuses in XLA (review item 10).
    def _prep_task(self, boxes, labels, *, flag, ncls):
        f32 = jnp.float32
        n_gt = boxes.shape[0]
        max_objs = self.max_objs
        local = labels.astype(jnp.int32) - jnp.int32(flag)   # 1-based id in task
        in_task = (local >= 1) & (local <= ncls)
        key = (jnp.where(in_task, local - 1, ncls) * n_gt
               + jnp.arange(n_gt, dtype=jnp.int32))
        order = jnp.argsort(key)                 # class-major, stable in index
        boxes_s = jnp.where(in_task[order][:, None], boxes[order], 0.0)
        cls0_s = jnp.where(in_task[order], local[order] - 1, 0).astype(jnp.int32)

        def fit(a):                              # truncate / zero-pad to max_objs
            if a.shape[0] >= max_objs:
                return a[:max_objs]
            pad = [(0, max_objs - a.shape[0])] + [(0, 0)] * (a.ndim - 1)
            return jnp.pad(a, pad)

        boxes_s = fit(boxes_s)
        cls0_s = fit(cls0_s)

        x, y, z = boxes_s[:, 0], boxes_s[:, 1], boxes_s[:, 2]
        w, l, h = boxes_s[:, 3], boxes_s[:, 4], boxes_s[:, 5]
        rot = boxes_s[:, 8]

        vx, vy = self.voxel_size[0], self.voxel_size[1]
        osf = float(self.out_size_factor)
        w_fm = w / vx / osf
        l_fm = l / vy / osf
        size_ok = (w_fm > 0.0) & (l_fm > 0.0)    # padded / other-task rows fail

        # gaussian_radius((length, width), overlap) -- CenterPoint formula.
        ov = self.gaussian_overlap
        hh, ww = l_fm, w_fm
        b1 = hh + ww
        c1 = ww * hh * (1.0 - ov) / (1.0 + ov)
        r1 = (b1 + jnp.sqrt(jnp.maximum(b1 * b1 - 4.0 * c1, 0.0))) / 2.0
        b2 = 2.0 * (hh + ww)
        c2 = (1.0 - ov) * ww * hh
        r2 = (b2 + jnp.sqrt(jnp.maximum(b2 * b2 - 16.0 * c2, 0.0))) / 2.0
        a3 = 4.0 * ov
        b3 = -2.0 * ov * (hh + ww)
        c3 = (ov - 1.0) * ww * hh
        r3 = (b3 + jnp.sqrt(jnp.maximum(b3 * b3 - 4.0 * a3 * c3, 0.0))) / 2.0
        radius = jnp.minimum(jnp.minimum(r1, r2), r3).astype(jnp.int32)  # trunc
        radius = jnp.maximum(radius, jnp.int32(self.min_radius))

        coor_x = (x - self.point_cloud_range[0]) / vx / osf
        coor_y = (y - self.point_cloud_range[1]) / vy / osf
        cxi = coor_x.astype(jnp.int32)           # trunc toward 0 == .to(int32)
        cyi = coor_y.astype(jnp.int32)
        in_bounds = (cxi >= 0) & (cxi < self.fw) & (cyi >= 0) & (cyi < self.fh)
        valid = size_ok & in_bounds

        ind = jnp.where(valid, cyi * self.fw + cxi, 0).astype(jnp.int32)
        mask = valid.astype(jnp.uint8)

        dims = [w, l, h]
        if self.norm_bbox:
            dims = [jnp.log(d) for d in dims]
        cols = ([coor_x - cxi.astype(f32), coor_y - cyi.astype(f32), z]
                + dims + [jnp.sin(rot), jnp.cos(rot)])
        if self.with_velocity:
            cols += [boxes_s[:, 6], boxes_s[:, 7]]
        anno = jnp.stack(cols, axis=-1)                      # (max_objs, anno_dim)
        anno = jnp.where(valid[:, None], anno, 0.0)

        n_obj = jnp.minimum(jnp.sum(in_task.astype(jnp.int32)),
                            jnp.int32(max_objs))

        # Compact int32 metadata table for the heatmap kernel (lane-padded).
        pad = self.max_objs_pad - max_objs

        def padc(v):
            return jnp.pad(v, (0, pad))

        zeros = jnp.zeros((self.max_objs_pad,), jnp.int32)
        meta = jnp.stack([
            padc(jnp.where(valid, cxi, 0)),
            padc(jnp.where(valid, cyi, 0)),
            padc(jnp.where(valid, radius, 0)),
            padc(valid.astype(jnp.int32)),
            padc(jnp.where(valid, cls0_s, 0)),
            zeros.at[0].set(n_obj),
            zeros,
            zeros,
        ], axis=0)                                           # (8, max_objs_pad)
        return anno, ind, mask, meta

    def __call__(self, gt_bboxes_3d, gt_labels_3d):
        # gt_bboxes_3d: (B, N_gt, 9) f32; gt_labels_3d: (B, N_gt) int (1-based)
        gt_bboxes_3d = jnp.asarray(gt_bboxes_3d, jnp.float32)
        gt_labels_3d = jnp.asarray(gt_labels_3d)
        batch = gt_bboxes_3d.shape[0]
        heatmaps, anno_boxes, inds, masks = [], [], [], []
        flag = 0
        for ncls in self.num_classes:
            prep = functools.partial(self._prep_task, flag=flag, ncls=ncls)
            anno, ind, mask, meta = jax.vmap(prep)(gt_bboxes_3d, gt_labels_3d)
            hm = self._heatmap_call(batch, ncls)(meta)
            heatmaps.append(hm)
            anno_boxes.append(anno)                  # (B, max_objs, anno_dim)
            # TODO(synk): torch returns int64 inds; int64 on TPU requires the
            # global jax_enable_x64 flag -- keep int32 on device, cast at host.
            inds.append(ind)
            masks.append(mask)
            flag += ncls
        return heatmaps, anno_boxes, inds, masks


# ---------------------------------------------------------------------------
# NumPy reference (direct port of the PyTorch module) for validation
# ---------------------------------------------------------------------------
def _gaussian_radius_ref(height, width, min_overlap):
    b1 = height + width
    c1 = width * height * (1 - min_overlap) / (1 + min_overlap)
    r1 = (b1 + np.sqrt(b1 ** 2 - 4 * c1)) / 2
    b2 = 2 * (height + width)
    c2 = (1 - min_overlap) * width * height
    r2 = (b2 + np.sqrt(b2 ** 2 - 16 * c2)) / 2
    a3 = 4 * min_overlap
    b3 = -2 * min_overlap * (height + width)
    c3 = (min_overlap - 1) * width * height
    r3 = (b3 + np.sqrt(b3 ** 2 - 4 * a3 * c3)) / 2
    return min(r1, r2, r3)


def _draw_gaussian_ref(heatmap, cx, cy, radius):
    sigma = (2 * radius + 1) / 6.0
    H, W = heatmap.shape
    for yy in range(max(0, cy - radius), min(H, cy + radius + 1)):
        for xx in range(max(0, cx - radius), min(W, cx + radius + 1)):
            v = np.exp(-((xx - cx) ** 2 + (yy - cy) ** 2) / (2 * sigma * sigma))
            heatmap[yy, xx] = max(heatmap[yy, xx], np.float32(v))


def reference_targets(gt_bboxes, gt_labels, class_names, grid_size, voxel_size,
                      pc_range, out_size_factor, max_objs, min_radius, overlap,
                      norm_bbox=True, with_velocity=False):
    gt_bboxes = np.asarray(gt_bboxes, np.float32)
    gt_labels = np.asarray(gt_labels)
    B = gt_bboxes.shape[0]
    fw = grid_size[0] // out_size_factor
    fh = grid_size[1] // out_size_factor
    anno_dim = 10 if with_velocity else 8
    per_sample = []
    for b in range(B):
        boxes, labels = gt_bboxes[b], gt_labels[b]
        task_boxes, task_classes = [], []
        flag = 0
        for names in class_names:
            tb, tc = [], []
            for ci in range(len(names)):
                m = np.where(labels == ci + 1 + flag)[0]
                tb.append(boxes[m])
                tc.append(labels[m] - flag)
            task_boxes.append(np.concatenate(tb, 0))
            task_classes.append(np.concatenate(tc, 0).astype(np.int64))
            flag += len(names)
        hms, annos, inds_, masks_ = [], [], [], []
        for t, names in enumerate(class_names):
            heatmap = np.zeros((len(names), fh, fw), np.float32)
            anno = np.zeros((max_objs, anno_dim), np.float32)
            ind = np.zeros((max_objs,), np.int64)
            msk = np.zeros((max_objs,), np.uint8)
            for k in range(min(task_boxes[t].shape[0], max_objs)):
                cls_id = int(task_classes[t][k]) - 1
                width = task_boxes[t][k][3] / voxel_size[0] / out_size_factor
                length = task_boxes[t][k][4] / voxel_size[1] / out_size_factor
                if width > 0 and length > 0:
                    radius = _gaussian_radius_ref(length, width, overlap)
                    radius = max(min_radius, int(radius))
                    x, y, z = task_boxes[t][k][0], task_boxes[t][k][1], task_boxes[t][k][2]
                    coor_x = (x - pc_range[0]) / voxel_size[0] / out_size_factor
                    coor_y = (y - pc_range[1]) / voxel_size[1] / out_size_factor
                    cx, cy = int(np.float32(coor_x)), int(np.float32(coor_y))
                    if not (0 <= cx < fw and 0 <= cy < fh):
                        continue
                    _draw_gaussian_ref(heatmap[cls_id], cx, cy, radius)
                    ind[k] = cy * fw + cx
                    msk[k] = 1
                    rot = task_boxes[t][k][8]
                    dims = task_boxes[t][k][3:6]
                    if norm_bbox:
                        dims = np.log(dims)
                    row = [coor_x - cx, coor_y - cy, z, *dims, np.sin(rot), np.cos(rot)]
                    if with_velocity:
                        row += [task_boxes[t][k][6], task_boxes[t][k][7]]
                    anno[k] = np.asarray(row, np.float32)
            hms.append(heatmap); annos.append(anno); inds_.append(ind); masks_.append(msk)
        per_sample.append((hms, annos, inds_, masks_))
    nt = len(class_names)
    heatmaps = [np.stack([per_sample[b][0][t] for b in range(B)]) for t in range(nt)]
    annos = [np.stack([per_sample[b][1][t] for b in range(B)]) for t in range(nt)]
    inds = [np.stack([per_sample[b][2][t] for b in range(B)]) for t in range(nt)]
    masks = [np.stack([per_sample[b][3][t] for b in range(B)]) for t in range(nt)]
    return heatmaps, annos, inds, masks


# ---------------------------------------------------------------------------
if __name__ == "__main__":
    tasks = [{"class_names": ["car"]},
             {"class_names": ["pedestrian", "cyclist"]}]
    # Feature map 512 x 32 (out_size_factor 4) so the lane-chunked splat path
    # (fw > 128, multiple of 128) is actually exercised.
    grid_size = [2048, 128, 40]
    voxel_size = [0.2, 0.2, 0.2]
    point_cloud_range = [-204.8, -12.8, -4.0, 204.8, 12.8, 4.0]

    module = CenterPointLidarTargetPallas(
        grid_size=grid_size, voxel_size=voxel_size,
        point_cloud_range=point_cloud_range, tasks=tasks,
        max_objs=32, gaussian_overlap=0.1, min_radius=2, out_size_factor=4)

    B, NGT = 2, 8
    key = jax.random.PRNGKey(0)
    k1, k2, k3, k4, k5, k6, k7 = jax.random.split(key, 7)
    x = jax.random.uniform(k1, (B, NGT, 1), jnp.float32, -210.0, 210.0)
    y = jax.random.uniform(k2, (B, NGT, 1), jnp.float32, -14.0, 14.0)
    z = jax.random.uniform(k3, (B, NGT, 1), jnp.float32, -2.0, 1.0)
    dims = jax.random.uniform(k4, (B, NGT, 3), jnp.float32, 0.5, 25.0)
    vel = jax.random.uniform(k5, (B, NGT, 2), jnp.float32, -1.0, 1.0)
    rot = jax.random.uniform(k6, (B, NGT, 1), jnp.float32, -3.14, 3.14)
    gt_bboxes_3d = jnp.concatenate([x, y, z, dims, vel, rot], axis=-1)  # (B, NGT, 9)
    gt_labels_3d = jax.random.randint(k7, (B, NGT), 1, 4, dtype=jnp.int32)

    heatmaps, anno_boxes, inds, masks = module(gt_bboxes_3d, gt_labels_3d)
    jax.block_until_ready((heatmaps, anno_boxes, inds, masks))

    ref_hm, ref_anno, ref_ind, ref_mask = reference_targets(
        gt_bboxes_3d, gt_labels_3d, module.class_names, grid_size, voxel_size,
        point_cloud_range, module.out_size_factor, module.max_objs,
        module.min_radius, module.gaussian_overlap)

    for t in range(len(tasks)):
        np.testing.assert_allclose(np.asarray(heatmaps[t]), ref_hm[t], atol=1e-3)
        np.testing.assert_allclose(np.asarray(anno_boxes[t]), ref_anno[t], atol=1e-3)
        np.testing.assert_array_equal(np.asarray(inds[t]), ref_ind[t])
        np.testing.assert_array_equal(np.asarray(masks[t]), ref_mask[t])
        assert heatmaps[t].dtype == jnp.float32
        assert anno_boxes[t].dtype == jnp.float32
        assert inds[t].dtype == jnp.int32
        assert masks[t].dtype == jnp.uint8

    print("KERNEL_OK")
</pallas_src>

<mosaic_0001>
module attributes {stable_mosaic.version = 11 : i64} {
  func.func @_heatmap_kernel(%arg0: i32, %arg1: i32, %arg2: memref<2x8x128xi32, #tpu.memory_space<any>>, %arg3: memref<1x1x32x512xf32, #tpu.memory_space<vmem>>, %arg4: memref<8x128xi32, #tpu.memory_space<smem>>, %arg5: memref<!tpu.dma_semaphore, #tpu.memory_space<semaphore_mem>>) attributes {dimension_semantics = [#tpu.dimension_semantics<parallel>, #tpu.dimension_semantics<parallel>], iteration_bounds = array<i64: 2, 1>, scalar_prefetch = 0 : i64, scratch_operands = 2 : i64, tpu.core_type = #tpu.core_type<tc>, window_params = [{}, {transform_indices = @transform_1, window_bounds = array<i64: 1, 1, 32, 512>}]} {
    %c32_i32 = arith.constant 32 : i32
    %0 = arith.muli %arg1, %c32_i32 : i32
    %c0_i32 = arith.constant 0 : i32
    %c0_i32_0 = arith.constant 0 : i32
    %1 = tpu.memref_slice %arg2[%arg0, %c0_i32, %c0_i32_0] : memref<2x8x128xi32, #tpu.memory_space<any>> -> memref<1x8x128xi32, #tpu.memory_space<any>>
    %2 = tpu.memref_squeeze %1 : memref<1x8x128xi32, #tpu.memory_space<any>> -> memref<8x128xi32, #tpu.memory_space<any>>
    tpu.enqueue_dma source(%2 : memref<8x128xi32, #tpu.memory_space<any>>) target(%arg4 : memref<8x128xi32, #tpu.memory_space<smem>>) target_semaphore(%arg5 : memref<!tpu.dma_semaphore, #tpu.memory_space<semaphore_mem>>)
    %cst = arith.constant 0.000000e+00 : f32
    %3 = vector.broadcast %cst : f32 to vector<1x32x512xf32>
    %c0 = arith.constant 0 : index
    %c0_1 = arith.constant 0 : index
    %c0_2 = arith.constant 0 : index
    %c0_3 = arith.constant 0 : index
    %4 = vector.load %arg3[%c0, %c0_1, %c0_2, %c0_3] : memref<1x1x32x512xf32, #tpu.memory_space<vmem>>, vector<1x1x32x512xf32>
    %5 = vector.shape_cast %4 : vector<1x1x32x512xf32> to vector<1x32x512xf32>
    %6 = vector.shape_cast %3 : vector<1x32x512xf32> to vector<1x1x32x512xf32>
    tpu.vector_store %arg3[%c0, %c0_1, %c0_2, %c0_3], %6 {strides = array<i32>} : memref<1x1x32x512xf32, #tpu.memory_space<vmem>>, vector<1x1x32x512xf32>,
    %c0_i32_4 = arith.constant 0 : i32
    %c0_i32_5 = arith.constant 0 : i32
    %7 = tpu.memref_slice %arg2[%arg0, %c0_i32_4, %c0_i32_5] : memref<2x8x128xi32, #tpu.memory_space<any>> -> memref<1x8x128xi32, #tpu.memory_space<any>>
    %8 = tpu.memref_squeeze %7 : memref<1x8x128xi32, #tpu.memory_space<any>> -> memref<8x128xi32, #tpu.memory_space<any>>
    tpu.wait_dma2 semaphore(%arg5 : memref<!tpu.dma_semaphore, #tpu.memory_space<semaphore_mem>>) src(%8 : memref<8x128xi32, #tpu.memory_space<any>>) dst(%arg4 : memref<8x128xi32, #tpu.memory_space<smem>>)
    %9 = tpu.iota {dimensions = array<i32: 0>} : vector<32x1xi32>
    %10 = vector.broadcast %0 : i32 to vector<32x1xi32>
    %11 = arith.addi %9, %10 : vector<32x1xi32>
    %12 = tpu.iota {dimensions = array<i32: 1>} : vector<1x128xi32>
    %c5 = arith.constant 5 : index
    %c0_6 = arith.constant 0 : index
    %13 = memref.load %arg4[%c5, %c0_6] : memref<8x128xi32, #tpu.memory_space<smem>>
    %c0_i32_7 = arith.constant 0 : i32
    %14 = arith.subi %13, %c0_i32_7 : i32
    %c1_i32 = arith.constant 1 : i32
    %c1_i32_8 = arith.constant 1 : i32
    %15 = arith.subi %c1_i32, %c1_i32_8 : i32
    %16 = arith.addi %14, %15 : i32
    %c1_i32_9 = arith.constant 1 : i32
    %17 = arith.divsi %16, %c1_i32_9 : i32
    %c1_i32_10 = arith.constant 1 : i32
    %c0_i32_11 = arith.constant 0 : i32
    %c0_i32_12 = arith.constant 0 : i32
    %18 = arith.subi %17, %c0_i32_12 : i32
    %19 = arith.addi %c0_i32_12, %18 : i32
    %c1_i32_13 = arith.constant 1 : i32
    scf.for %arg6 = %c0_i32_12 to %19 step %c1_i32_13  : i32 {
      %20 = arith.muli %arg6, %c1_i32_10 : i32
      %21 = arith.addi %c0_i32_11, %20 : i32
      %c0_14 = arith.constant 0 : index
      %22 = arith.index_cast %21 : i32 to index
      %23 = memref.load %arg4[%c0_14, %22] : memref<8x128xi32, #tpu.memory_space<smem>>
      %c1 = arith.constant 1 : index
      %24 = arith.index_cast %21 : i32 to index
      %25 = memref.load %arg4[%c1, %24] : memref<8x128xi32, #tpu.memory_space<smem>>
      %c2 = arith.constant 2 : index
      %26 = arith.index_cast %21 : i32 to index
      %27 = memref.load %arg4[%c2, %26] : memref<8x128xi32, #tpu.memory_space<smem>>
      %c3 = arith.constant 3 : index
      %28 = arith.index_cast %21 : i32 to index
      %29 = memref.load %arg4[%c3, %28] : memref<8x128xi32, #tpu.memory_space<smem>>
      %c4 = arith.constant 4 : index
      %30 = arith.index_cast %21 : i32 to index
      %31 = memref.load %arg4[%c4, %30] : memref<8x128xi32, #tpu.memory_space<smem>>
      %c1_i32_15 = arith.constant 1 : i32
      %32 = arith.cmpi eq, %29, %c1_i32_15 : i32
      %33 = arith.addi %25, %27 : i32
      %34 = arith.cmpi sge, %33, %0 : i32
      %35 = arith.andi %32, %34 : i1
      %36 = arith.subi %25, %27 : i32
      %c32_i32_16 = arith.constant 32 : i32
      %37 = arith.addi %0, %c32_i32_16 : i32
      %c1_i32_17 = arith.constant 1 : i32
      %38 = arith.subi %37, %c1_i32_17 : i32
      %39 = arith.cmpi sle, %36, %38 : i32
      %40 = arith.andi %35, %39 : i1
      %41 = arith.extui %40 : i1 to i32
      %c0_i32_18 = arith.constant 0 : i32
      %42 = arith.cmpi ne, %41, %c0_i32_18 : i32
      scf.if %42 {
        %c0_i32_19 = arith.constant 0 : i32
        %43 = arith.cmpi sge, %31, %c0_i32_19 : i32
        %c1_i32_20 = arith.constant 1 : i32
        %44 = arith.cmpi slt, %31, %c1_i32_20 : i32
        %45 = arith.andi %43, %44 : i1
        %true = arith.constant true
        %46 = arith.xori %45, %true : i1
        %false = arith.constant false
        %47 = arith.ori %false, %46 : i1
        %false_21 = arith.constant false
        %c1_i32_22 = arith.constant 1 : i32
        %c-1_i32 = arith.constant -1 : i32
        %48 = arith.select %false_21, %c-1_i32, %c1_i32_22 : i32
        %49 = arith.sitofp %27 : i32 to f32
        %cst_23 = arith.constant 2.000000e+00 : f32
        %50 = arith.mulf %cst_23, %49 : f32
        %cst_24 = arith.constant 1.000000e+00 : f32
        %51 = arith.addf %50, %cst_24 : f32
        %cst_25 = arith.constant 6.000000e+00 : f32
        %52 = arith.divf %51, %cst_25 : f32
        %53 = arith.mulf %52, %52 : f32
        %cst_26 = arith.constant 5.000000e-01 : f32
        %54 = arith.divf %cst_26, %53 : f32
        %55 = vector.broadcast %25 : i32 to vector<32x1xi32>
        %56 = arith.subi %11, %55 : vector<32x1xi32>
        %57 = arith.sitofp %56 : vector<32x1xi32> to vector<32x1xf32>
        %58 = math.absf %57 : vector<32x1xf32>
        %59 = vector.broadcast %49 : f32 to vector<32x1xf32>
        %60 = arith.cmpf ole, %58, %59 : vector<32x1xf32>
        %61 = arith.mulf %57, %57 : vector<32x1xf32>
        %cst_27 = arith.constant 0.000000e+00 : f32
        %62 = vector.broadcast %cst_27 : f32 to vector<32x1xf32>
        %63 = arith.subf %62, %61 : vector<32x1xf32>
        %64 = vector.broadcast %54 : f32 to vector<32x1xf32>
        %65 = arith.mulf %63, %64 : vector<32x1xf32>
        %66 = math.exp %65 : vector<32x1xf32>
        %cst_28 = arith.constant 0.000000e+00 : f32
        %67 = vector.broadcast %cst_28 : f32 to vector<32x1xf32>
        %68 = arith.select %60, %66, %67 : vector<32x1xi1>, vector<32x1xf32>
        %69 = arith.addi %23, %27 : i32
        %c0_i32_29 = arith.constant 0 : i32
        %70 = arith.cmpi sge, %69, %c0_i32_29 : i32
        %71 = arith.subi %23, %27 : i32
        %c128_i32 = arith.constant 128 : i32
        %72 = arith.cmpi slt, %71, %c128_i32 : i32
        %73 = arith.andi %70, %72 : i1
        %74 = arith.extui %73 : i1 to i32
        %c0_i32_30 = arith.constant 0 : i32
        %75 = arith.cmpi ne, %74, %c0_i32_30 : i32
        scf.if %75 {
          %c0_i32_37 = arith.constant 0 : i32
          %97 = arith.subi %c0_i32_37, %23 : i32
          %98 = vector.broadcast %97 : i32 to vector<1x128xi32>
          %99 = arith.addi %12, %98 : vector<1x128xi32>
          %100 = arith.sitofp %99 : vector<1x128xi32> to vector<1x128xf32>
          %101 = math.absf %100 : vector<1x128xf32>
          %102 = vector.broadcast %49 : f32 to vector<1x128xf32>
          %103 = arith.cmpf ole, %101, %102 : vector<1x128xf32>
          %104 = arith.mulf %100, %100 : vector<1x128xf32>
          %cst_38 = arith.constant 0.000000e+00 : f32
          %105 = vector.broadcast %cst_38 : f32 to vector<1x128xf32>
          %106 = arith.subf %105, %104 : vector<1x128xf32>
          %107 = vector.broadcast %54 : f32 to vector<1x128xf32>
          %108 = arith.mulf %106, %107 : vector<1x128xf32>
          %109 = math.exp %108 : vector<1x128xf32>
          %cst_39 = arith.constant 0.000000e+00 : f32
          %110 = vector.broadcast %cst_39 : f32 to vector<1x128xf32>
          %111 = arith.select %103, %109, %110 : vector<1x128xi1>, vector<1x128xf32>
          %112 = vector.broadcast %68 : vector<32x1xf32> to vector<32x128xf32>
          %113 = vector.broadcast %111 : vector<1x128xf32> to vector<32x128xf32>
          %114 = arith.mulf %112, %113 : vector<32x128xf32>
          %c0_40 = arith.constant 0 : index
          %115 = arith.index_cast %31 : i32 to index
          %c0_41 = arith.constant 0 : index
          %c0_42 = arith.constant 0 : index
          %116 = vector.load %arg3[%c0_40, %115, %c0_41, %c0_42] : memref<1x1x32x512xf32, #tpu.memory_space<vmem>>, vector<1x1x32x128xf32>
          %117 = vector.shape_cast %116 : vector<1x1x32x128xf32> to vector<32x128xf32>
          %118 = arith.maximumf %117, %114 : vector<32x128xf32>
          %c0_43 = arith.constant 0 : index
          %119 = arith.index_cast %31 : i32 to index
          %c0_44 = arith.constant 0 : index
          %c0_45 = arith.constant 0 : index
          %120 = vector.load %arg3[%c0_43, %119, %c0_44, %c0_45] : memref<1x1x32x512xf32, #tpu.memory_space<vmem>>, vector<1x1x32x128xf32>
          %121 = vector.shape_cast %120 : vector<1x1x32x128xf32> to vector<32x128xf32>
          %122 = vector.shape_cast %118 : vector<32x128xf32> to vector<1x1x32x128xf32>
          tpu.vector_store %arg3[%c0_43, %119, %c0_44, %c0_45], %122 {strides = array<i32>} : memref<1x1x32x512xf32, #tpu.memory_space<vmem>>, vector<1x1x32x128xf32>,
        } else {
        }
        %76 = arith.addi %23, %27 : i32
        %c128_i32_31 = arith.constant 128 : i32
        %77 = arith.cmpi sge, %76, %c128_i32_31 : i32
        %78 = arith.subi %23, %27 : i32
        %c256_i32 = arith.constant 256 : i32
        %79 = arith.cmpi slt, %78, %c256_i32 : i32
        %80 = arith.andi %77, %79 : i1
        %81 = arith.extui %80 : i1 to i32
        %c0_i32_32 = arith.constant 0 : i32
        %82 = arith.cmpi ne, %81, %c0_i32_32 : i32
        scf.if %82 {
          %c128_i32_37 = arith.constant 128 : i32
          %97 = arith.subi %c128_i32_37, %23 : i32
          %98 = vector.broadcast %97 : i32 to vector<1x128xi32>
          %99 = arith.addi %12, %98 : vector<1x128xi32>
          %100 = arith.sitofp %99 : vector<1x128xi32> to vector<1x128xf32>
          %101 = math.absf %100 : vector<1x128xf32>
          %102 = vector.broadcast %49 : f32 to vector<1x128xf32>
          %103 = arith.cmpf ole, %101, %102 : vector<1x128xf32>
          %104 = arith.mulf %100, %100 : vector<1x128xf32>
          %cst_38 = arith.constant 0.000000e+00 : f32
          %105 = vector.broadcast %cst_38 : f32 to vector<1x128xf32>
          %106 = arith.subf %105, %104 : vector<1x128xf32>
          %107 = vector.broadcast %54 : f32 to vector<1x128xf32>
          %108 = arith.mulf %106, %107 : vector<1x128xf32>
          %109 = math.exp %108 : vector<1x128xf32>
          %cst_39 = arith.constant 0.000000e+00 : f32
          %110 = vector.broadcast %cst_39 : f32 to vector<1x128xf32>
          %111 = arith.select %103, %109, %110 : vector<1x128xi1>, vector<1x128xf32>
          %112 = vector.broadcast %68 : vector<32x1xf32> to vector<32x128xf32>
          %113 = vector.broadcast %111 : vector<1x128xf32> to vector<32x128xf32>
          %114 = arith.mulf %112, %113 : vector<32x128xf32>
          %c0_40 = arith.constant 0 : index
          %115 = arith.index_cast %31 : i32 to index
          %c0_41 = arith.constant 0 : index
          %c128 = arith.constant 128 : index
          %116 = vector.load %arg3[%c0_40, %115, %c0_41, %c128] : memref<1x1x32x512xf32, #tpu.memory_space<vmem>>, vector<1x1x32x128xf32>
          %117 = vector.shape_cast %116 : vector<1x1x32x128xf32> to vector<32x128xf32>
          %118 = arith.maximumf %117, %114 : vector<32x128xf32>
          %c0_42 = arith.constant 0 : index
          %119 = arith.index_cast %31 : i32 to index
          %c0_43 = arith.constant 0 : index
          %c128_44 = arith.constant 128 : index
          %120 = vector.load %arg3[%c0_42, %119, %c0_43, %c128_44] : memref<1x1x32x512xf32, #tpu.memory_space<vmem>>, vector<1x1x32x128xf32>
          %121 = vector.shape_cast %120 : vector<1x1x32x128xf32> to vector<32x128xf32>
          %122 = vector.shape_cast %118 : vector<32x128xf32> to vector<1x1x32x128xf32>
          tpu.vector_store %arg3[%c0_42, %119, %c0_43, %c128_44], %122 {strides = array<i32>} : memref<1x1x32x512xf32, #tpu.memory_space<vmem>>, vector<1x1x32x128xf32>,
        } else {
        }
        %83 = arith.addi %23, %27 : i32
        %c256_i32_33 = arith.constant 256 : i32
        %84 = arith.cmpi sge, %83, %c256_i32_33 : i32
        %85 = arith.subi %23, %27 : i32
        %c384_i32 = arith.constant 384 : i32
        %86 = arith.cmpi slt, %85, %c384_i32 : i32
        %87 = arith.andi %84, %86 : i1
        %88 = arith.extui %87 : i1 to i32
        %c0_i32_34 = arith.constant 0 : i32
        %89 = arith.cmpi ne, %88, %c0_i32_34 : i32
        scf.if %89 {
          %c256_i32_37 = arith.constant 256 : i32
          %97 = arith.subi %c256_i32_37, %23 : i32
          %98 = vector.broadcast %97 : i32 to vector<1x128xi32>
          %99 = arith.addi %12, %98 : vector<1x128xi32>
          %100 = arith.sitofp %99 : vector<1x128xi32> to vector<1x128xf32>
          %101 = math.absf %100 : vector<1x128xf32>
          %102 = vector.broadcast %49 : f32 to vector<1x128xf32>
          %103 = arith.cmpf ole, %101, %102 : vector<1x128xf32>
          %104 = arith.mulf %100, %100 : vector<1x128xf32>
          %cst_38 = arith.constant 0.000000e+00 : f32
          %105 = vector.broadcast %cst_38 : f32 to vector<1x128xf32>
          %106 = arith.subf %105, %104 : vector<1x128xf32>
          %107 = vector.broadcast %54 : f32 to vector<1x128xf32>
          %108 = arith.mulf %106, %107 : vector<1x128xf32>
          %109 = math.exp %108 : vector<1x128xf32>
          %cst_39 = arith.constant 0.000000e+00 : f32
          %110 = vector.broadcast %cst_39 : f32 to vector<1x128xf32>
          %111 = arith.select %103, %109, %110 : vector<1x128xi1>, vector<1x128xf32>
          %112 = vector.broadcast %68 : vector<32x1xf32> to vector<32x128xf32>
          %113 = vector.broadcast %111 : vector<1x128xf32> to vector<32x128xf32>
          %114 = arith.mulf %112, %113 : vector<32x128xf32>
          %c0_40 = arith.constant 0 : index
          %115 = arith.index_cast %31 : i32 to index
          %c0_41 = arith.constant 0 : index
          %c256 = arith.constant 256 : index
          %116 = vector.load %arg3[%c0_40, %115, %c0_41, %c256] : memref<1x1x32x512xf32, #tpu.memory_space<vmem>>, vector<1x1x32x128xf32>
          %117 = vector.shape_cast %116 : vector<1x1x32x128xf32> to vector<32x128xf32>
          %118 = arith.maximumf %117, %114 : vector<32x128xf32>
          %c0_42 = arith.constant 0 : index
          %119 = arith.index_cast %31 : i32 to index
          %c0_43 = arith.constant 0 : index
          %c256_44 = arith.constant 256 : index
          %120 = vector.load %arg3[%c0_42, %119, %c0_43, %c256_44] : memref<1x1x32x512xf32, #tpu.memory_space<vmem>>, vector<1x1x32x128xf32>
          %121 = vector.shape_cast %120 : vector<1x1x32x128xf32> to vector<32x128xf32>
          %122 = vector.shape_cast %118 : vector<32x128xf32> to vector<1x1x32x128xf32>
          tpu.vector_store %arg3[%c0_42, %119, %c0_43, %c256_44], %122 {strides = array<i32>} : memref<1x1x32x512xf32, #tpu.memory_space<vmem>>, vector<1x1x32x128xf32>,
        } else {
        }
        %90 = arith.addi %23, %27 : i32
        %c384_i32_35 = arith.constant 384 : i32
        %91 = arith.cmpi sge, %90, %c384_i32_35 : i32
        %92 = arith.subi %23, %27 : i32
        %c512_i32 = arith.constant 512 : i32
        %93 = arith.cmpi slt, %92, %c512_i32 : i32
        %94 = arith.andi %91, %93 : i1
        %95 = arith.extui %94 : i1 to i32
        %c0_i32_36 = arith.constant 0 : i32
        %96 = arith.cmpi ne, %95, %c0_i32_36 : i32
        scf.if %96 {
          %c384_i32_37 = arith.constant 384 : i32
          %97 = arith.subi %c384_i32_37, %23 : i32
          %98 = vector.broadcast %97 : i32 to vector<1x128xi32>
          %99 = arith.addi %12, %98 : vector<1x128xi32>
          %100 = arith.sitofp %99 : vector<1x128xi32> to vector<1x128xf32>
          %101 = math.absf %100 : vector<1x128xf32>
          %102 = vector.broadcast %49 : f32 to vector<1x128xf32>
          %103 = arith.cmpf ole, %101, %102 : vector<1x128xf32>
          %104 = arith.mulf %100, %100 : vector<1x128xf32>
          %cst_38 = arith.constant 0.000000e+00 : f32
          %105 = vector.broadcast %cst_38 : f32 to vector<1x128xf32>
          %106 = arith.subf %105, %104 : vector<1x128xf32>
          %107 = vector.broadcast %54 : f32 to vector<1x128xf32>
          %108 = arith.mulf %106, %107 : vector<1x128xf32>
          %109 = math.exp %108 : vector<1x128xf32>
          %cst_39 = arith.constant 0.000000e+00 : f32
          %110 = vector.broadcast %cst_39 : f32 to vector<1x128xf32>
          %111 = arith.select %103, %109, %110 : vector<1x128xi1>, vector<1x128xf32>
          %112 = vector.broadcast %68 : vector<32x1xf32> to vector<32x128xf32>
          %113 = vector.broadcast %111 : vector<1x128xf32> to vector<32x128xf32>
          %114 = arith.mulf %112, %113 : vector<32x128xf32>
          %c0_40 = arith.constant 0 : index
          %115 = arith.index_cast %31 : i32 to index
          %c0_41 = arith.constant 0 : index
          %c384 = arith.constant 384 : index
          %116 = vector.load %arg3[%c0_40, %115, %c0_41, %c384] : memref<1x1x32x512xf32, #tpu.memory_space<vmem>>, vector<1x1x32x128xf32>
          %117 = vector.shape_cast %116 : vector<1x1x32x128xf32> to vector<32x128xf32>
          %118 = arith.maximumf %117, %114 : vector<32x128xf32>
          %c0_42 = arith.constant 0 : index
          %119 = arith.index_cast %31 : i32 to index
          %c0_43 = arith.constant 0 : index
          %c384_44 = arith.constant 384 : index
          %120 = vector.load %arg3[%c0_42, %119, %c0_43, %c384_44] : memref<1x1x32x512xf32, #tpu.memory_space<vmem>>, vector<1x1x32x128xf32>
          %121 = vector.shape_cast %120 : vector<1x1x32x128xf32> to vector<32x128xf32>
          %122 = vector.shape_cast %118 : vector<32x128xf32> to vector<1x1x32x128xf32>
          tpu.vector_store %arg3[%c0_42, %119, %c0_43, %c384_44], %122 {strides = array<i32>} : memref<1x1x32x512xf32, #tpu.memory_space<vmem>>, vector<1x1x32x128xf32>,
        } else {
        }
      } else {
      }
    }
    return
  }
  func.func @transform_1(%arg0: i32, %arg1: i32) -> (i32, i32, i32, i32) {
    %c0_i32 = arith.constant 0 : i32
    %c0_i32_0 = arith.constant 0 : i32
    %c0_i32_1 = arith.constant 0 : i32
    return %arg0, %c0_i32, %arg1, %c0_i32_0 : i32, i32, i32, i32
  }
}

</mosaic_0001>

<bundles_post_ra>
// kernel: tpu_custom_call.1
= control target key start
LH: loop header
LB: loop body
LE: loop exit
PB: predicated region body
PF: predicated region fallthrough
CT: control target
= control target key end

     0   :  { %6 = vsyncpa [#allocation5], 0  ;;  %s900_s0 = inlined_call_operand.hbm [shape: s32[2,8,128], index: 0, kind: input, shape index: {}]   ;;  %s901_s1 = inlined_call_operand.hbm [shape: f32[2,1,32,512], index: 1, kind: output, shape index: {}]  }
   0x1   :  { %8 = vsyncpa [#allocation5 + $0x1], 0  ;;  %s676_s6 = smov 0   ;;  %s678_s7 = smov 0  }
   0x2   :  { %s680_s8 = smov 0   ;;  %s682_s9 = smov 0  }
   0x3 LB: > { %s23_s10 = sadd.s32 1, %s651_s8  ;;  %s461_s11 = sadd.s32 4294967295, %s655_s9   ;;  %s655_s9 = sphi %s682_s9, %s14_s9   ;;  %s651_s8 = sphi %s680_s8, %s907_s8   ;;  %s647_s7 = sphi %s678_s7, %s906_s7   ;;  %s643_s6 = sphi %s676_s6, %s905_s6  }
   0x4   : > { %p25_p0 = scmp.ge.s32.totalorder %s23_s10, 2  ;;  %p41_p1 = scmp.ne.s32.totalorder %s647_s7, %s643_s6 }
   0x5   : > { %s32_s12 = sadd.s32 1, %s647_s7  ;;  %p42_p2 = scmp.eq.s32.totalorder %s461_s11, 1 }
   0x6   : > { %s909_s10 = smov (%p25_p0, %s23_s10), 0  ;;  %p36_p3 = scmp.eq.s32.totalorder %s655_s9, 1 }
   0x7   : > { %s27_s13 = ssub.s32 %s651_s8, %s909_s10  ;;  %p706_p6 = por %p42_p2, %p41_p1 }
   0x8   : > { %p30_p4 = scmp.eq.s32.totalorder %s27_s13, 0  ;;  %p462_p5 = scmp.ne.s32.totalorder %s27_s13, 0 }
   0x9   : > { %p463_p8 = scmp.ge.s32.totalorder %s655_s9, 2 }
   0xa   : > { %s711_s15 = scalar_select %p30_p4, %s647_s7, %s32_s12  }
   0xb   : > { %p713_p7 = por %p462_p5, %p36_p3  ;;  %51 = sbr.rel (%p463_p8) target bundleno = 387 (0x183), region = 12 }
   0xc   : > { %s465_s17 = sshll.u32 (!%p463_p8), %s651_s8, 3  ;;  %s56_s21 = sand.u32 (!%p463_p8), 1, %s647_s7  }
   0xd   : > { %s62_s20 = scalar_lea.hbm (!%p463_p8), %s900_s0, %s465_s17  ;;  %s464_s23 = sshll.u32 (!%p463_p8), %s56_s21, 7 }
   0xe   : > { %s70_s22 = sshll.u32 (!%p463_p8), %s62_s20, 4  ;;  %s661_s24 = smov (!%p463_p8), [#allocation2]   ;;  %s71_s22 = int_to_ptr.hbm [resolvable:$true] %s70_s22 }
   0xf   : > { %73 = dma.hbm_to_smem (!%p463_p8), %s71_s22, 128, %s661_s24, [#allocation3] }
  0x10   : > { %s725_s25 = scalar_lea.vmem [#allocation4], %s464_s23  ;;  %v662_v0 = vmov 0.0  }
  0x11   : > { %74 = vst [vmem:[%s725_s25] sm:$0xff] %v662_v0 }
  0x12   : > { %75 = vst [vmem:[%s725_s25 + $0x8] sm:$0xff] %v662_v0 }
  0x13   : > { %76 = vst [vmem:[%s725_s25 + $0x10] sm:$0xff] %v662_v0 }
  0x14   : > { %77 = vst [vmem:[%s725_s25 + $0x18] sm:$0xff] %v662_v0 }
  0x15   : > { %78 = vst [vmem:[%s725_s25 + $0x20] sm:$0xff] %v662_v0 }
  0x16   : > { %79 = vst [vmem:[%s725_s25 + $0x28] sm:$0xff] %v662_v0 }
  0x17   : > { %80 = vst [vmem:[%s725_s25 + $0x30] sm:$0xff] %v662_v0 }
  0x18   : > { %81 = vst [vmem:[%s725_s25 + $0x38] sm:$0xff] %v662_v0 }
  0x19   : > { %82 = vst [vmem:[%s725_s25 + $0x40] sm:$0xff] %v662_v0 }
  0x1a   : > { %83 = vst [vmem:[%s725_s25 + $0x48] sm:$0xff] %v662_v0 }
  0x1b   : > { %84 = vst [vmem:[%s725_s25 + $0x50] sm:$0xff] %v662_v0 }
  0x1c   : > { %85 = vst [vmem:[%s725_s25 + $0x58] sm:$0xff] %v662_v0 }
  0x1d   : > { %86 = vst [vmem:[%s725_s25 + $0x60] sm:$0xff] %v662_v0 }
  0x1e   : > { %87 = vst [vmem:[%s725_s25 + $0x68] sm:$0xff] %v662_v0 }
  0x1f   : > { %88 = vst [vmem:[%s725_s25 + $0x70] sm:$0xff] %v662_v0 }
  0x20   : > { %89 = vst [vmem:[%s725_s25 + $0x78] sm:$0xff] %v662_v0 }
  0x21   : > { %635 = dma.done.wait [#allocation3], 128 }
  0x22   : > { %636 = vsyncadd [#allocation3], 4294967168 }
  0x23   : > { %93 = sfence }
  0x24   : > { %v94_v1 = vlaneseq  ;;  %s743_s26 = sld [smem:[#allocation2 + $0x280]] }
  0x26   : > { %v745_v2 = vshrl.u32 %v94_v1, 7  ;;  %v747_v3 = vand.u32 127, %v94_v1 }
  0x28   : > { %v750_v4 = vadd.s32 8, %v745_v2  ;;  %v753_v5 = vadd.s32 16, %v745_v2  ;;  %v756_v6 = vadd.s32 24, %v745_v2 }
  0x2a   : > { %p467_p9 = scmp.le.s32.totalorder %s743_s26, 0 }
  0x2b   : > { %s759_s27 = smov (!%p467_p9), 0  }
  0x2c   : > { %444 = sbr.rel (%p467_p9) target bundleno = 382 (0x17e), region = 74 }
  0x31 LB: >> { %s765_s28 = sld [smem:[#allocation2 + %s659_s27]]  ;;  %s114_s29 = sshra.s32 %s659_s27, 7  ;;  %s659_s27 = sphi %s759_s27, %s110_s27  }
  0x32   : >> { %s486_s30 = sshll.u32 %s114_s29, 7  ;;  %s119_s2 = sand.u32 127, %s659_s27 }
  0x33   : >> { %s487_s3 = sadd.s32 128, %s486_s30  ;;  %s489_s4 = sadd.s32 256, %s486_s30 }
  0x34   : >> { %s120_s5 = sadd.s32 %s487_s3, %s119_s2  ;;  %s124_s11 = sadd.s32 %s489_s4, %s119_s2 }
  0x35   : >> { %s769_s12 = sld [smem:[#allocation2 + %s120_s5]]  ;;  %s491_s13 = sadd.s32 384, %s486_s30 }
  0x36   : >> { %s771_s17 = sld [smem:[#allocation2 + %s124_s11]]  ;;  %s128_s18 = sadd.s32 %s491_s13, %s119_s2 }
  0x37   : >> { %s129_s19 = sld [smem:[#allocation2 + %s128_s18]]  ;;  %s493_s20 = sadd.s32 512, %s486_s30 }
  0x38   : >> { %s132_s22 = sadd.s32 %s493_s20, %s119_s2 }
  0x39   : >> { %s773_s23 = sld [smem:[#allocation2 + %s132_s22]] }
  0x3c   : >> { %s135_s24 = sadd.s32 %s771_s17, %s769_s12  ;;  %s139_s29 = ssub.s32 %s769_s12, %s771_s17 }
  0x3d   : >> { %p134_p10 = scmp.eq.s32.totalorder %s129_s19, 1  ;;  %p136_p11 = scmp.ge.s32.totalorder %s135_s24, 0 }
  0x3e   : >> { %p141_p13 = scmp.le.s32.totalorder %s139_s29, 31 }
  0x3f   : >> { %p137_p12 = pnand %p136_p11, %p134_p10 }
  0x41   : >> { %p138_p0 = pneg %p137_p12 }
  0x43   : >> { %p142_p1 = pnand %p141_p13, %p138_p0 }
  0x44   : >> { %s781_s30 = sadd.s32 (!%p142_p1), %s771_s17, %s765_s28  ;;  %s785_s2 = ssub.s32 (!%p142_p1), %s765_s28, %s771_s17 }
  0x45   : >> { %145 = sbr.rel (%p142_p1) target bundleno = 374 (0x176), region = 27  ;;  %p220_p2 = scmp.ge.s32.totalorder (!%p142_p1), %s781_s30, 0 }
  0x46   : >> { %p222_p3 = scmp.lt.s32.totalorder (!%p142_p1), %s785_s2, 128  ;;  %s146_s4 = scvt.s32.f32 (!%p142_p1), %s771_s17 }
  0x48   : >> { %p789_p4 = pnand (!%p142_p1), %p222_p3, %p220_p2  ;;  %s147_s5 = smul.f32 (!%p142_p1), 2.0, %s146_s4 }
  0x4a   : >> { %v663_v7 = vmov 6.0   ;;  %s148_s11 = sadd.f32 1.0, %s147_s5  ;;  %v176_v25 = vstv %s769_s12  ;;  %v809_v52 = vstv %s146_s4  ;;  %s227_s17 = ssub.s32 (!%p789_p4), 0, %s765_s28 }
  0x4b   : >> { %555 = vrcp.f32 %v663_v7  ;;  %v177_v26 = vsub.s32 %v745_v2, %v176_v25  ;;  %v178_v27 = vsub.s32 %v750_v4, %v176_v25  ;;  %v179_v28 = vsub.s32 %v753_v5, %v176_v25  ;;  %s494_s22 = sshll.u32 (!%p789_p4), %s773_s23, 7 }
  0x4c   : >> { %v180_v29 = vsub.s32 %v756_v6, %v176_v25  ;;  %s245_s24 = scalar_lea.vmem (!%p789_p4), %s725_s25, %s494_s22 [#allocation4] }
  0x4d   : >> { %v181_v30 = vcvt.s32.f32 %v177_v26  ;;  %v182_v31 = vcvt.s32.f32 %v178_v27  ;;  %v183_v32 = vcvt.s32.f32 %v179_v28 }
  0x4e   : >> { %v184_v33 = vcvt.s32.f32 %v180_v29 }
  0x4f   : >> { %v194_v34 = vmul.f32 %v181_v30, %v181_v30  ;;  %v195_v35 = vmul.f32 %v182_v31, %v182_v31  ;;  %v196_v36 = vmul.f32 %v183_v32, %v183_v32  ;;  %v185_v51 = vand.u32 2147483647, %v181_v30 }
  0x50   : >> { %v197_v37 = vmul.f32 %v184_v33, %v184_v33  ;;  %v186_v53 = vand.u32 2147483647, %v182_v31  ;;  %v187_v54 = vand.u32 2147483647, %v183_v32  ;;  %v188_v55 = vand.u32 2147483647, %v184_v33 }
  0x51   : >> { %v556_v8 = vpop.eup %555  ;;  %v198_v38 = vsub.f32 0.0, %v194_v34  ;;  %v199_v39 = vsub.f32 0.0, %v195_v35  ;;  %v200_v40 = vsub.f32 0.0, %v196_v36  ;;  %vm190_vm5 = vcmp.le.f32.partialorder %v185_v51, %v809_v52 }
  0x52   : >> { %v150_v9 = vmul.f32 6.0, %v556_v8  ;;  %vm154_vm0 = vweird.f32 %v556_v8  ;;  %v201_v41 = vsub.f32 0.0, %v197_v37  ;;  %vm191_vm6 = vcmp.le.f32.partialorder %v186_v53, %v809_v52 }
  0x53   : >> { %vm192_vm7 = vcmp.le.f32.partialorder %v187_v54, %v809_v52  ;;  %vm193_vm8 = vcmp.le.f32.partialorder %v188_v55, %v809_v52 }
  0x54   : >> { %v151_v10 = vsub.f32 1.0, %v150_v9 }
  0x56   : >> { %v152_v11 = vmul.f32 %v556_v8, %v151_v10 }
  0x58   : >> { %v153_v12 = vadd.f32 %v556_v8, %v152_v11 }
  0x5a   : >> { %v155_v13 = vsel %vm154_vm0, %v556_v8, %v153_v12 }
  0x5b   : >> { %499 = vpush %v155_v13 }
  0x8c   : >> { %s500_s13 = spop %499 }
  0x8d   : >> { %s157_s18 = smul.f32 %s500_s13, %s148_s11 }
  0x8f   : >> { %s158_s19 = smul.f32 %s157_s18, %s157_s18 }
  0x91   : >> { %v159_v14 = vstv %s158_s19 }
  0x92   : >> { %557 = vrcp.f32 %v159_v14  ;;  %v171_v18 = vand.u32 2147483648, %v159_v14  ;;  %v169_v20 = vand.u32 2147483647, %v159_v14  ;;  %vm165_vm2 = vweird.f32 %v159_v14 }
  0x94   : >> { %v172_v22 = vor.u32 1.1754944e-38, %v171_v18  ;;  %vm170_vm4 = vcmp.eq.f32.partialorder %v169_v20, 8.507059e+37 }
  0x98   : >> { %v558_v15 = vpop.eup %557 }
  0x99   : >> { %v161_v16 = vmul.f32 %v558_v15, %v159_v14  ;;  %vm166_vm1 = vweird.f32 %v558_v15 }
  0x9a   : >> { %vm167_vm3 = vmor %vm165_vm2, %vm166_vm1 }
  0x9b   : >> { %v162_v17 = vsub.f32 1.0, %v161_v16 }
  0x9d   : >> { %v163_v19 = vmul.f32 %v558_v15, %v162_v17 }
  0x9f   : >> { %v164_v21 = vadd.f32 %v558_v15, %v163_v19 }
  0xa1   : >> { %v168_v23 = vsel %vm167_vm3, %v558_v15, %v164_v21 }
  0xa2   : >> { %v173_v24 = vsel %vm170_vm4, %v172_v22, %v168_v23 }
  0xa3   : >> { %501 = vpush %v173_v24 }
  0xd4   : >> { %s502_s20 = spop %501 }
  0xd5   : >> { %s175_s12 = smul.f32 0.5, %s502_s20 }
  0xd7   : >> { %v801_v42 = vstv %s175_s12 }
  0xd8   : >> { %v203_v43 = vmul.f32 %v801_v42, %v198_v38  ;;  %v204_v44 = vmul.f32 %v801_v42, %v199_v39  ;;  %v205_v45 = vmul.f32 %v801_v42, %v200_v40  ;;  %v206_v46 = vmul.f32 %v801_v42, %v201_v41 }
  0xda   : >> { %v207_v47 = vmul.f32 1.442695, %v203_v43  ;;  %v209_v48 = vmul.f32 1.442695, %v204_v44  ;;  %v211_v49 = vmul.f32 1.442695, %v205_v45 }
  0xdb   : >> { %v213_v50 = vmul.f32 1.442695, %v206_v46 }
  0xdc   : >> { %559 = vpow2.f32 %v207_v47 }
  0xdd   : >> { %561 = vpow2.f32 %v209_v48 }
  0xde   : >> { %563 = vpow2.f32 %v211_v49 }
  0xdf   : >> { %565 = vpow2.f32 %v213_v50 }
  0xe2   : >> { %v560_v56 = vpop.eup %559  ;;  %226 = sbr.rel (%p789_p4) target bundleno = 260 (0x104), region = 31 }
  0xe3   : >> { %v562_v57 = vpop.eup %561  ;;  %v815_v58 = vsel %vm190_vm5, %v560_v56, 0.0 }
  0xe4   : >> { %v564_v59 = vpop.eup %563  ;;  %v817_v60 = vsel %vm191_vm6, %v562_v57, 0.0 }
  0xe5   : >> { %v566_v61 = vpop.eup %565  ;;  %v819_v62 = vsel %vm192_vm7, %v564_v59, 0.0 }
  0xe6   : >> { %v821_v63 = vsel %vm193_vm8, %v566_v61, 0.0 }
  0xe7   : >> { %v228_v0 = vstv %s227_s17  ;;  %v246_v15 = vld [vmem:[%s245_s24] sm:$0xff] }
  0xe8   : >> { %v229_v1 = vadd.s32 %v228_v0, %v747_v3  ;;  %v247_v16 = vld [vmem:[%s245_s24 + $0x20] sm:$0xff] }
  0xe9   : >> { %v248_v17 = vld [vmem:[%s245_s24 + $0x40] sm:$0xff] }
  0xea   : >> { %v230_v7 = vcvt.s32.f32 %v229_v1  ;;  %v249_v22 = vld [vmem:[%s245_s24 + $0x60] sm:$0xff] }
  0xec   : >> { %v233_v8 = vmul.f32 %v230_v7, %v230_v7  ;;  %v231_v12 = vand.u32 2147483647, %v230_v7 }
  0xee   : >> { %v234_v9 = vsub.f32 0.0, %v233_v8  ;;  %vm232_vm9 = vcmp.le.f32.partialorder %v231_v12, %v809_v52 }
  0xf0   : >> { %v235_v10 = vmul.f32 %v234_v9, %v801_v42 }
  0xf2   : >> { %v236_v11 = vmul.f32 1.442695, %v235_v10 }
  0xf4   : >> { %567 = vpow2.f32 %v236_v11 }
  0xfa   : >> { %v568_v13 = vpop.eup %567 }
  0xfb   : >> { %v238_v14 = vsel %vm232_vm9, %v568_v13, 0.0 }
  0xfc   : >> { %v239_v18 = vmul.f32 %v238_v14, %v815_v58  ;;  %v240_v19 = vmul.f32 %v238_v14, %v817_v60  ;;  %v241_v20 = vmul.f32 %v238_v14, %v819_v62  ;;  %v242_v21 = vmul.f32 %v238_v14, %v821_v63 }
  0xfe   : >> { %v250_v23 = vmax.f32 %v246_v15, %v239_v18  ;;  %v251_v24 = vmax.f32 %v247_v16, %v240_v19  ;;  %v252_v25 = vmax.f32 %v248_v17, %v241_v20  ;;  %v253_v26 = vmax.f32 %v249_v22, %v242_v21 }
 0x100   : >> { %254 = vst [vmem:[%s245_s24] sm:$0xff] %v250_v23 }
 0x101   : >> { %255 = vst [vmem:[%s245_s24 + $0x20] sm:$0xff] %v251_v24 }
 0x102   : >> { %256 = vst [vmem:[%s245_s24 + $0x40] sm:$0xff] %v252_v25 }
 0x103   : >> { %257 = vst [vmem:[%s245_s24 + $0x60] sm:$0xff] %v253_v26 }
 0x104 PF: >> { %p258_p5 = scmp.ge.s32.totalorder %s781_s30, 128  ;;  %p259_p8 = scmp.lt.s32.totalorder %s785_s2, 256 }
 0x106   : >> { %p260_p9 = pnand %p259_p8, %p258_p5 }
 0x107   : >> { %s264_s29 = ssub.s32 (!%p260_p9), 128, %s765_s28  ;;  %s495_s3 = sshll.u32 (!%p260_p9), %s773_s23, 7 }
 0x108   : >> { %263 = sbr.rel (%p260_p9) target bundleno = 298 (0x12a), region = 35  ;;  %s282_s4 = scalar_lea.vmem (!%p260_p9), %s725_s25, %s495_s3 [#allocation4] }
 0x10d   : >> { %v265_v27 = vstv %s264_s29  ;;  %v283_v37 = vld [vmem:[%s282_s4 + $0x8] sm:$0xff] }
 0x10e   : >> { %v266_v28 = vadd.s32 %v265_v27, %v747_v3  ;;  %v284_v38 = vld [vmem:[%s282_s4 + $0x28] sm:$0xff] }
 0x10f   : >> { %v285_v39 = vld [vmem:[%s282_s4 + $0x48] sm:$0xff] }
 0x110   : >> { %v267_v29 = vcvt.s32.f32 %v266_v28  ;;  %v286_v45 = vld [vmem:[%s282_s4 + $0x68] sm:$0xff] }
 0x112   : >> { %v270_v30 = vmul.f32 %v267_v29, %v267_v29  ;;  %v268_v34 = vand.u32 2147483647, %v267_v29 }
 0x114   : >> { %v271_v31 = vsub.f32 0.0, %v270_v30  ;;  %vm269_vm10 = vcmp.le.f32.partialorder %v268_v34, %v809_v52 }
 0x116   : >> { %v272_v32 = vmul.f32 %v271_v31, %v801_v42 }
 0x118   : >> { %v273_v33 = vmul.f32 1.442695, %v272_v32 }
 0x11a   : >> { %569 = vpow2.f32 %v273_v33 }
 0x120   : >> { %v570_v35 = vpop.eup %569 }
 0x121   : >> { %v275_v36 = vsel %vm269_vm10, %v570_v35, 0.0 }
 0x122   : >> { %v276_v40 = vmul.f32 %v275_v36, %v815_v58  ;;  %v277_v41 = vmul.f32 %v275_v36, %v817_v60  ;;  %v278_v43 = vmul.f32 %v275_v36, %v819_v62  ;;  %v279_v44 = vmul.f32 %v275_v36, %v821_v63 }
 0x124   : >> { %v287_v46 = vmax.f32 %v283_v37, %v276_v40  ;;  %v288_v47 = vmax.f32 %v284_v38, %v277_v41  ;;  %v289_v48 = vmax.f32 %v285_v39, %v278_v43  ;;  %v290_v49 = vmax.f32 %v286_v45, %v279_v44 }
 0x126   : >> { %291 = vst [vmem:[%s282_s4 + $0x8] sm:$0xff] %v287_v46 }
 0x127   : >> { %292 = vst [vmem:[%s282_s4 + $0x28] sm:$0xff] %v288_v47 }
 0x128   : >> { %293 = vst [vmem:[%s282_s4 + $0x48] sm:$0xff] %v289_v48 }
 0x129   : >> { %294 = vst [vmem:[%s282_s4 + $0x68] sm:$0xff] %v290_v49 }
 0x12a PF: >> { %p295_p10 = scmp.ge.s32.totalorder %s781_s30, 256  ;;  %p296_p11 = scmp.lt.s32.totalorder %s785_s2, 384 }
 0x12c   : >> { %p297_p12 = pnand %p296_p11, %p295_p10 }
 0x12d   : >> { %s301_s5 = ssub.s32 (!%p297_p12), 256, %s765_s28  ;;  %s496_s11 = sshll.u32 (!%p297_p12), %s773_s23, 7 }
 0x12e   : >> { %300 = sbr.rel (%p297_p12) target bundleno = 336 (0x150), region = 39  ;;  %s319_s13 = scalar_lea.vmem (!%p297_p12), %s725_s25, %s496_s11 [#allocation4] }
 0x133   : >> { %v302_v50 = vstv %s301_s5  ;;  %v320_v1 = vld [vmem:[%s319_s13 + $0x10] sm:$0xff] }
 0x134   : >> { %v303_v51 = vadd.s32 %v302_v50, %v747_v3  ;;  %v321_v7 = vld [vmem:[%s319_s13 + $0x30] sm:$0xff] }
 0x135   : >> { %v322_v8 = vld [vmem:[%s319_s13 + $0x50] sm:$0xff] }
 0x136   : >> { %v304_v53 = vcvt.s32.f32 %v303_v51  ;;  %v323_v13 = vld [vmem:[%s319_s13 + $0x70] sm:$0xff] }
 0x138   : >> { %v307_v54 = vmul.f32 %v304_v53, %v304_v53  ;;  %v305_v59 = vand.u32 2147483647, %v304_v53 }
 0x13a   : >> { %v308_v55 = vsub.f32 0.0, %v307_v54  ;;  %vm306_vm11 = vcmp.le.f32.partialorder %v305_v59, %v809_v52 }
 0x13c   : >> { %v309_v56 = vmul.f32 %v308_v55, %v801_v42 }
 0x13e   : >> { %v310_v57 = vmul.f32 1.442695, %v309_v56 }
 0x140   : >> { %571 = vpow2.f32 %v310_v57 }
 0x146   : >> { %v572_v61 = vpop.eup %571 }
 0x147   : >> { %v312_v0 = vsel %vm306_vm11, %v572_v61, 0.0 }
 0x148   : >> { %v313_v9 = vmul.f32 %v312_v0, %v815_v58  ;;  %v314_v10 = vmul.f32 %v312_v0, %v817_v60  ;;  %v315_v11 = vmul.f32 %v312_v0, %v819_v62  ;;  %v316_v12 = vmul.f32 %v312_v0, %v821_v63 }
 0x14a   : >> { %v324_v14 = vmax.f32 %v320_v1, %v313_v9  ;;  %v325_v15 = vmax.f32 %v321_v7, %v314_v10  ;;  %v326_v16 = vmax.f32 %v322_v8, %v315_v11  ;;  %v327_v17 = vmax.f32 %v323_v13, %v316_v12 }
 0x14c   : >> { %328 = vst [vmem:[%s319_s13 + $0x10] sm:$0xff] %v324_v14 }
 0x14d   : >> { %329 = vst [vmem:[%s319_s13 + $0x30] sm:$0xff] %v325_v15 }
 0x14e   : >> { %330 = vst [vmem:[%s319_s13 + $0x50] sm:$0xff] %v326_v16 }
 0x14f   : >> { %331 = vst [vmem:[%s319_s13 + $0x70] sm:$0xff] %v327_v17 }
 0x150 PF: >> { %p332_p13 = scmp.ge.s32.totalorder %s781_s30, 384  ;;  %p333_p0 = scmp.lt.s32.totalorder %s785_s2, 512 }
 0x152   : >> { %p334_p1 = pnand %p333_p0, %p332_p13 }
 0x153   : >> { %s338_s18 = ssub.s32 (!%p334_p1), 384, %s765_s28  ;;  %s497_s19 = sshll.u32 (!%p334_p1), %s773_s23, 7 }
 0x154   : >> { %337 = sbr.rel (%p334_p1) target bundleno = 374 (0x176), region = 43  ;;  %s356_s30 = scalar_lea.vmem (!%p334_p1), %s725_s25, %s497_s19 [#allocation4] }
 0x159   : >> { %v339_v18 = vstv %s338_s18  ;;  %v357_v28 = vld [vmem:[%s356_s30 + $0x18] sm:$0xff] }
 0x15a   : >> { %v340_v19 = vadd.s32 %v339_v18, %v747_v3  ;;  %v358_v29 = vld [vmem:[%s356_s30 + $0x38] sm:$0xff] }
 0x15b   : >> { %v359_v30 = vld [vmem:[%s356_s30 + $0x58] sm:$0xff] }
 0x15c   : >> { %v341_v20 = vcvt.s32.f32 %v340_v19  ;;  %v360_v34 = vld [vmem:[%s356_s30 + $0x78] sm:$0xff] }
 0x15e   : >> { %v344_v21 = vmul.f32 %v341_v20, %v341_v20  ;;  %v342_v25 = vand.u32 2147483647, %v341_v20 }
 0x160   : >> { %v345_v22 = vsub.f32 0.0, %v344_v21  ;;  %vm343_vm12 = vcmp.le.f32.partialorder %v342_v25, %v809_v52 }
 0x162   : >> { %v346_v23 = vmul.f32 %v345_v22, %v801_v42 }
 0x164   : >> { %v347_v24 = vmul.f32 1.442695, %v346_v23 }
 0x166   : >> { %573 = vpow2.f32 %v347_v24 }
 0x16c   : >> { %v574_v26 = vpop.eup %573 }
 0x16d   : >> { %v349_v27 = vsel %vm343_vm12, %v574_v26, 0.0 }
 0x16e   : >> { %v350_v31 = vmul.f32 %v349_v27, %v815_v58  ;;  %v351_v32 = vmul.f32 %v349_v27, %v817_v60  ;;  %v352_v33 = vmul.f32 %v349_v27, %v819_v62  ;;  %v353_v42 = vmul.f32 %v349_v27, %v821_v63 }
 0x170   : >> { %v361_v35 = vmax.f32 %v357_v28, %v350_v31  ;;  %v362_v36 = vmax.f32 %v358_v29, %v351_v32  ;;  %v363_v37 = vmax.f32 %v359_v30, %v352_v33  ;;  %v364_v38 = vmax.f32 %v360_v34, %v353_v42 }
 0x172   : >> { %365 = vst [vmem:[%s356_s30 + $0x18] sm:$0xff] %v361_v35 }
 0x173   : >> { %366 = vst [vmem:[%s356_s30 + $0x38] sm:$0xff] %v362_v36 }
 0x174   : >> { %367 = vst [vmem:[%s356_s30 + $0x58] sm:$0xff] %v363_v37 }
 0x175   : >> { %368 = vst [vmem:[%s356_s30 + $0x78] sm:$0xff] %v364_v38 }
 0x176 PF: >> { %s110_s27 = sadd.s32 1, %s659_s27  }
 0x177   : >> { %p109_p2 = scmp.ge.s32.totalorder %s110_s27, %s743_s26 }
 0x179   : > { %112 = sbr.rel (!%p109_p2) target bundleno = 49 (0x31), region = 80 }
 0x17e PF: > { %s498_s28 = sshll.u32 %s651_s8, 7  ;;  %s385_s12 = sshll.u32 %s725_s25, 4  ;;  %s386_s12 = int_to_ptr.vmem [resolvable:$true] %s385_s12 }
 0x17f   : > { %s384_s20 = scalar_lea.hbm %s901_s1, %s498_s28  ;;  %s370_s22 = scalar_lea.sflag [#allocation5], %s56_s21 }
 0x180   : > { %s387_s17 = sshll.u32 %s384_s20, 4  ;;  %s664_s24 = smov 512   ;;  %s388_s17 = int_to_ptr.hbm [resolvable:$true] %s387_s17 }
 0x181   : > { %s665_s29 = smov 32  }
 0x182   : > { %503 = dma.vmem_to_hbm [thread:$0]  (%p713_p7), %s386_s12, 2048, %s388_s17, %s370_s22, %s664_s24, %s664_s24, %s665_s29  }
 0x183 PF: > { %p509_p3 = scmp.ge.s32.totalorder %s655_s9, 1  ;;  %s402_s8 = sand.u32 1, %s643_s6  }
 0x184   : > { %s403_s26 = scalar_lea.sflag [#allocation5], %s402_s8 }
 0x185   : > { %p506_p4 = pnand %p509_p3, %p706_p6 }
 0x187   : > { %p507_p5 = pneg %p506_p4 }
 0x189   : > { %638 = dma.done.wait (%p507_p5), %s403_s26, 2048  }
 0x18a   : > { %640 = vsyncadd (%p507_p5), %s403_s26, 4294965248  ;;  %s14_s9 = sadd.s32 1, %s655_s9   ;;  %s905_s6 = smov %s647_s7 }
 0x18b   : > { %p11_p8 = scmp.ge.s32.totalorder %s14_s9, 3   ;;  %s906_s7 = smov %s711_s15 }
 0x18c   : > { %s907_s8 = smov %s909_s10 }
 0x18d   :  { %13 = sbr.rel (!%p11_p8) target bundleno = 3 (0x3), region = 91 }
 0x192   :  { %409 = vsyncpa [#allocation5], 1 }
 0x193   :  { %411 = vsyncpa [#allocation5 + $0x1], 1 }
 0x194   :  { %412 = vsyncmov [#allocation3] }
 0x197   :  { %s413_s14 = vpop.sfrf %412 }
 0x198   :  { %p485_p6 = scmp.ne.s32.totalorder %s413_s14, 0 }
 0x19a   :  { %417 = shalt.err (%p485_p6)  }

</bundles_post_ra>
